<compile_context>
chip_gen: v7x
topology: tpu7x:2x2x1
jax: 0.10.0
libtpu: 0.0.40
codegen_flags: <defaults>
</compile_context>

<pallas_src>
import jax
import jax.numpy as jnp
from jax.experimental import pallas as pl
from jax.experimental.pallas import tpu as pltpu

_LANE = 128
_SUB = 8


def _pde_linear_kernel(x_ref, w_ref, o_ref):
    # VPU elementwise multiply; the (1, td) weight tile broadcasts over the
    # (tb, td) x tile along the sublane (batch) axis.
    o_ref[...] = x_ref[...] * w_ref[...]


def _vmem_capacity_bytes():
    try:
        return int(pltpu.get_tpu_info().vmem_capacity_bytes)
    except Exception:
        return 64 << 20  # conservative fallback (v7x per-TensorCore VMEM)


def _choose_tiles(B, D, itemsize, target_bytes):
    """Pick (tb, td) tiles for a (B, D) elementwise op.

    td (lane axis) is a multiple of 128 or the full D; tb (sublane axis) is a
    multiple of 8 or the full B.  The x/out tile lands near target_bytes.
    """
    tb_min = B if B <= _SUB else _SUB
    max_td = max(_LANE, target_bytes // (tb_min * itemsize))
    if D > max_td:
        # One full row does not fit the budget even at minimal batch packing:
        # keep tb minimal and tile the lane axis in 128-multiples.
        return tb_min, (max_td // _LANE) * _LANE
    # Whole row fits: take td = D and pack batch rows up to the budget.
    # Round to nearest (not truncate) so the tile lands close to target_bytes.
    row_bytes = D * itemsize
    tb_want = max(1, int(round(target_bytes / row_bytes)))
    if tb_want >= B or B <= _SUB:
        return B, D
    tb = int(round(tb_want / _SUB)) * _SUB
    tb = max(_SUB, min(tb, (B // _SUB) * _SUB))
    return tb, D


def pde_linear(x, weight, *, target_tile_bytes=None, force_pallas=False):
    """PDELinear forward: x * weight with weight of shape (1, dim1, dim2)."""
    B, dim1, dim2 = x.shape
    assert weight.shape == (1, dim1, dim2), (weight.shape, (1, dim1, dim2))

    # Match PyTorch type promotion (e.g. bf16 x * f32 weight -> f32 output).
    out_dtype = jnp.result_type(x.dtype, weight.dtype)
    D = dim1 * dim2
    itemsize = jnp.dtype(out_dtype).itemsize

    # Tiny problems: a pallas_call launch + pipeline prologue costs more than
    # the whole XLA-fused multiply.
    if not force_pallas and B * D * itemsize < (1 << 20):
        return x.astype(out_dtype) * weight.astype(out_dtype)

    vmem_cap = _vmem_capacity_bytes()
    if target_tile_bytes is None:
        # ~6.4 MiB tiles on v7x (64 MiB VMEM per TC), 8 MiB on v5e/v6e.
        target_tile_bytes = int(min(8 << 20, max(1 << 20, vmem_cap // 10)))

    x2 = x.astype(out_dtype).reshape(B, D)
    w2 = weight.astype(out_dtype).reshape(1, D)

    tb, td = _choose_tiles(B, D, itemsize, target_tile_bytes)
    grid = (pl.cdiv(D, td), pl.cdiv(B, tb))  # D outer, batch inner (fastest)

    tile_x_bytes = tb * td * itemsize
    tile_w_bytes = td * itemsize
    # Double-buffered x, out and weight tiles plus compiler headroom.
    needed = 2 * (2 * tile_x_bytes + tile_w_bytes) + (4 << 20)
    vmem_limit = int(min(vmem_cap, max(needed, 32 << 20)))

    # Memory-bound: read x once, weight once, write out once.
    cost = pl.CostEstimate(
        flops=B * D,
        transcendentals=0,
        bytes_accessed=(2 * B * D + D) * itemsize,
    )

    out2 = pl.pallas_call(
        _pde_linear_kernel,
        out_shape=jax.ShapeDtypeStruct((B, D), out_dtype),
        grid_spec=pltpu.PrefetchScalarGridSpec(
            num_scalar_prefetch=0,
            grid=grid,
            in_specs=[
                # x: (tb, td) tile, advances with both grid axes.
                pl.BlockSpec((tb, td), lambda d, b: (b, d)),
                # weight: block index independent of the inner (batch) axis ->
                # DMA'd once per outer step, kept resident across batch steps.
                pl.BlockSpec((1, td), lambda d, b: (0, d)),
            ],
            out_specs=pl.BlockSpec((tb, td), lambda d, b: (b, d)),
        ),
        compiler_params=pltpu.CompilerParams(
            dimension_semantics=("parallel", "parallel"),
            vmem_limit_bytes=vmem_limit,
        ),
        cost_estimate=cost,
    )(x2, w2)
    return out2.reshape(B, dim1, dim2)


def init_pde_linear_weight(key, dim1, dim2, dtype=jnp.float32):
    # nn.init.uniform_(weight, -0.1, +0.1)
    lim = 0.1
    return jax.random.uniform(key, (1, dim1, dim2), dtype=dtype,
                              minval=-lim, maxval=+lim)


def _check(key, B, dim1, dim2, x_dtype=jnp.float32, w_dtype=jnp.float32,
           force_pallas=True):
    k_w, k_x = jax.random.split(key)
    w = init_pde_linear_weight(k_w, dim1, dim2, dtype=w_dtype)
    x = jax.random.normal(k_x, (B, dim1, dim2), dtype=jnp.float32).astype(x_dtype)
    out = jax.block_until_ready(pde_linear(x, w, force_pallas=force_pallas))
    out_dtype = jnp.result_type(x_dtype, w_dtype)
    ref = x.astype(out_dtype) * w.astype(out_dtype)
    assert out.shape == (B, dim1, dim2), out.shape
    assert out.dtype == out_dtype, (out.dtype, out_dtype)
    assert jnp.allclose(out, ref, atol=1e-6, rtol=1e-6), (B, dim1, dim2)


if __name__ == "__main__":
    root = jax.random.PRNGKey(0)
    ks = jax.random.split(root, 5)

    # 1) Small shape from the module spec; force the Pallas path (grid=(1,1)).
    _check(ks[0], 2, 16, 128)
    # 2) dim2 not a multiple of 128 -> flattened lane-dense layout.
    _check(ks[1], 2, 16, 100)
    # 3) Mixed precision: bf16 activations * f32 weight -> f32 output.
    _check(ks[2], 2, 16, 128, x_dtype=jnp.bfloat16)
    # 4) >1 MiB: batch-packed tiling via the default (non-forced) Pallas path.
    _check(ks[3], 4, 256, 384, force_pallas=False)
    # 5) Large row -> lane-tiled path; weight reused across inner batch steps.
    _check(ks[4], 2, 2048, 512)

    print("KERNEL_OK")
</pallas_src>

<mosaic_0001>
module attributes {stable_mosaic.version = 11 : i64} {
  func.func @_pde_linear_kernel(%arg0: i32, %arg1: i32, %arg2: memref<2x2048xf32, #tpu.memory_space<vmem>>, %arg3: memref<1x2048xf32, #tpu.memory_space<vmem>>, %arg4: memref<2x2048xf32, #tpu.memory_space<vmem>>) attributes {dimension_semantics = [#tpu.dimension_semantics<parallel>, #tpu.dimension_semantics<parallel>], iteration_bounds = array<i64: 1, 1>, scalar_prefetch = 0 : i64, scratch_operands = 0 : i64, tpu.core_type = #tpu.core_type<tc>, window_params = [{transform_indices = @transform_0, window_bounds = array<i64: 2, 2048>}, {transform_indices = @transform_1, window_bounds = array<i64: 1, 2048>}, {transform_indices = @transform_2, window_bounds = array<i64: 2, 2048>}]} {
    %c0 = arith.constant 0 : index
    %c0_0 = arith.constant 0 : index
    %0 = vector.load %arg2[%c0, %c0_0] : memref<2x2048xf32, #tpu.memory_space<vmem>>, vector<2x2048xf32>
    %c0_1 = arith.constant 0 : index
    %c0_2 = arith.constant 0 : index
    %1 = vector.load %arg3[%c0_1, %c0_2] : memref<1x2048xf32, #tpu.memory_space<vmem>>, vector<1x2048xf32>
    %2 = vector.broadcast %1 : vector<1x2048xf32> to vector<2x2048xf32>
    %3 = arith.mulf %0, %2 : vector<2x2048xf32>
    %c0_3 = arith.constant 0 : index
    %c0_4 = arith.constant 0 : index
    %4 = vector.load %arg4[%c0_3, %c0_4] : memref<2x2048xf32, #tpu.memory_space<vmem>>, vector<2x2048xf32>
    tpu.vector_store %arg4[%c0_3, %c0_4], %3 {strides = array<i32>} : memref<2x2048xf32, #tpu.memory_space<vmem>>, vector<2x2048xf32>,
    return
  }
  func.func @transform_0(%arg0: i32, %arg1: i32) -> (i32, i32) {
    %c0_i32 = arith.constant 0 : i32
    return %arg1, %arg0 : i32, i32
  }
  func.func @transform_1(%arg0: i32, %arg1: i32) -> (i32, i32) {
    %c0_i32 = arith.constant 0 : i32
    %c0_i32_0 = arith.constant 0 : i32
    return %c0_i32, %arg0 : i32, i32
  }
  func.func @transform_2(%arg0: i32, %arg1: i32) -> (i32, i32) {
    %c0_i32 = arith.constant 0 : i32
    return %arg1, %arg0 : i32, i32
  }
}

</mosaic_0001>

<bundles_post_ra>
// kernel: tpu_custom_call.1
= control target key start
LH: loop header
LB: loop body
LE: loop exit
PB: predicated region body
PF: predicated region fallthrough
CT: control target
= control target key end

     0   :  { %7 = vsyncpa [#allocation3], 0  ;;  %s335_s0 = inlined_call_operand.hbm [shape: f32[2,2048], index: 0, kind: input, shape index: {}]   ;;  %s336_s1 = inlined_call_operand.hbm [shape: f32[1,2048], index: 1, kind: input, shape index: {}]   ;;  %s337_s2 = inlined_call_operand.hbm [shape: f32[2,2048], index: 2, kind: output, shape index: {}]  }
   0x1   :  { %8 = vsyncpa [#allocation6], 0 }
   0x2   :  { %9 = vsyncpa [#allocation4], 0  ;;  %s280_s9 = smov [#allocation2]   ;;  %s281_s11 = smov [#allocation5]  }
   0x3   :  { %s16_s10 = sshll.u32 %s280_s9, 4  ;;  %s26_s12 = sshll.u32 %s281_s11, 4  ;;  %s17_s10 = int_to_ptr.vmem [resolvable:$true] %s16_s10  ;;  %s27_s12 = int_to_ptr.vmem [resolvable:$true] %s26_s12 }
   0x4   :  { %s208_s15 = scalar_lea.hbm %s335_s0, 512 }
   0x5   :  { %p209_p0 = scmp.ne.s32.totalorder %s335_s0, %s208_s15  ;;  %p212_p1 = scmp.lt.u32.totalorder %s208_s15, %s335_s0 }
   0x7   :  { %p214_p2 = pnand %p212_p1, %p209_p0 }
   0x9   :  { %217 = shalt.err (!%p214_p2)
}
   0xa   :  { %s218_s20 = scalar_lea.vmem %s17_s10, 512  ;;  %p223_p4 = scmp.lt.s32.totalorder %s17_s10, %s17_s10 }
   0xb   :  { %p219_p3 = scmp.ne.s32.totalorder %s17_s10, %s218_s20  ;;  %p224_p5 = scmp.lt.s32.totalorder %s218_s20, %s218_s20 }
   0xd   :  { %p225_p6 = por %p224_p5, %p223_p4 }
   0xf   :  { %p226_p7 = pnand %p225_p6, %p219_p3 }
  0x11   :  { %229 = shalt.err (!%p226_p7)
}
  0x12   :  { %19 = dma.hbm_to_vmem [thread:$0]  %s335_s0, 512, %s17_s10, [#allocation3]  }
  0x13   :  { %s230_s25 = scalar_lea.hbm %s336_s1, 256 }
  0x14   :  { %p231_p8 = scmp.ne.s32.totalorder %s336_s1, %s230_s25  ;;  %p234_p9 = scmp.lt.u32.totalorder %s230_s25, %s336_s1 }
  0x16   :  { %p236_p10 = pnand %p234_p9, %p231_p8 }
  0x18   :  { %239 = shalt.err (!%p236_p10)
}
  0x19   :  { %s240_s30 = scalar_lea.vmem %s27_s12, 256  ;;  %p245_p12 = scmp.lt.s32.totalorder %s27_s12, %s27_s12 }
  0x1a   :  { %p241_p11 = scmp.ne.s32.totalorder %s27_s12, %s240_s30  ;;  %p246_p13 = scmp.lt.s32.totalorder %s240_s30, %s240_s30 }
  0x1c   :  { %p247_p0 = por %p246_p13, %p245_p12 }
  0x1e   :  { %p248_p1 = pnand %p247_p0, %p241_p11 }
  0x20   :  { %251 = shalt.err (!%p248_p1)
}
  0x21   :  { %29 = dma.hbm_to_vmem [thread:$0]  %s336_s1, 256, %s27_s12, [#allocation6]  }
  0x22   :  { %274 = dma.done.wait [#allocation3], 512  }
  0x23   :  { %275 = vsyncadd [#allocation3], 4294966784 }
  0x24   :  { %276 = dma.done.wait [#allocation6], 256  }
  0x25   :  { %277 = vsyncadd [#allocation6], 4294967040  ;;  %v44_v0 = vlaneseq  ;;  %v282_v1 = vmov 1983009808   ;;  %v40_v13 = vld [vmem:[#allocation5] sm:$0xff]  ;;  %v41_v19 = vld [vmem:[#allocation5 + $0x8] sm:$0xff] }
  0x26   :  { %v111_v2 = vunpack.c.l.s4 %v282_v1  ;;  %v36_v36 = vld [vmem:[#allocation2] sm:$0xff]  ;;  %v37_v42 = vld [vmem:[#allocation2 + $0x8] sm:$0xff]  ;;  %v38_v50 = vld [vmem:[#allocation2 + $0x10] sm:$0xff]  ;;  %s283_s1 = smov [#allocation7]  }
  0x27   :  { %v45_v3 = vshrl.u32 %v44_v0, 7  ;;  %v39_v57 = vld [vmem:[#allocation2 + $0x18] sm:$0xff]  ;;  %s194_s4 = sshll.u32 %s283_s1, 4  ;;  %s195_s4 = int_to_ptr.vmem [resolvable:$true] %s194_s4 }
  0x28   :  { %v112_v4 = vunpack.c.0.s8 %v111_v2  ;;  %s252_s5 = scalar_lea.vmem %s195_s4, 512  ;;  %p257_p3 = scmp.lt.s32.totalorder %s195_s4, %s195_s4 }
  0x29   :  { %v46_v5 = vsub.s32 0, %v45_v3  ;;  %v50_v6 = vsub.s32 1, %v45_v3  ;;  %v54_v7 = vsub.s32 2, %v45_v3  ;;  %v58_v8 = vsub.s32 3, %v45_v3  ;;  %p253_p2 = scmp.ne.s32.totalorder %s195_s4, %s252_s5  ;;  %p258_p4 = scmp.lt.s32.totalorder %s252_s5, %s252_s5 }
  0x2a   :  { %v62_v9 = vsub.s32 4, %v45_v3  ;;  %v66_v10 = vsub.s32 5, %v45_v3  ;;  %v70_v11 = vsub.s32 6, %v45_v3  ;;  %v74_v12 = vsub.s32 7, %v45_v3 }
  0x2b   :  { %v115_v14 = vsub.s32 %v112_v4, %v45_v3  ;;  %v47_v15 = vrot.slane %v40_v13, %v46_v5  ;;  %v51_v16 = vrot.slane %v40_v13, %v50_v6  ;;  %v55_v17 = vrot.slane %v40_v13, %v54_v7  ;;  %p259_p5 = por %p258_p4, %p257_p3 }
  0x2c   :  { %v59_v18 = vrot.slane %v40_v13, %v58_v8  ;;  %v63_v20 = vrot.slane %v40_v13, %v62_v9  ;;  %v67_v21 = vrot.slane %v40_v13, %v66_v10  ;;  %v71_v22 = vrot.slane %v40_v13, %v70_v11 }
  0x2d   :  { %v75_v23 = vrot.slane %v40_v13, %v74_v12  ;;  %v108_v24 = vcombine.low %v47_v15, %v51_v16  ;;  %v79_v26 = vrot.slane %v41_v19, %v46_v5  ;;  %v83_v27 = vrot.slane %v41_v19, %v50_v6  ;;  %p260_p6 = pnand %p259_p5, %p253_p2 }
  0x2e   :  { %v109_v25 = vcombine.low %v55_v17, %v59_v18  ;;  %v125_v28 = vcombine.low %v63_v20, %v67_v21  ;;  %v87_v30 = vrot.slane %v41_v19, %v54_v7  ;;  %v91_v31 = vrot.slane %v41_v19, %v58_v8 }
  0x2f   :  { %v126_v29 = vcombine.low %v71_v22, %v75_v23  ;;  %v116_v32 = vrot.slane %v108_v24, %v115_v14  ;;  %v142_v34 = vcombine.low %v79_v26, %v83_v27  ;;  %v95_v35 = vrot.slane %v41_v19, %v62_v9 }
  0x30   :  { %v123_v33 = vrot.slane %v109_v25, %v115_v14  ;;  %v133_v37 = vrot.slane %v125_v28, %v115_v14  ;;  %v143_v39 = vcombine.low %v87_v30, %v91_v31  ;;  %v99_v40 = vrot.slane %v41_v19, %v66_v10 }
  0x31   :  { %v140_v38 = vrot.slane %v126_v29, %v115_v14  ;;  %v150_v43 = vrot.slane %v142_v34, %v115_v14  ;;  %v103_v44 = vrot.slane %v41_v19, %v70_v11  ;;  %v107_v45 = vrot.slane %v41_v19, %v74_v12 }
  0x32   :  { %v124_v41 = vcombine.low %v116_v32, %v123_v33  ;;  %v157_v47 = vrot.slane %v143_v39, %v115_v14  ;;  %v159_v48 = vcombine.low %v95_v35, %v99_v40 }
  0x33   :  { %v141_v46 = vcombine.low %v133_v37, %v140_v38  ;;  %v160_v51 = vcombine.low %v103_v44, %v107_v45 }
  0x34   :  { %v180_v49 = vmul.f32 %v124_v41, %v36_v36  ;;  %v158_v53 = vcombine.low %v150_v43, %v157_v47  ;;  %v167_v54 = vrot.slane %v159_v48, %v115_v14 }
  0x35   :  { %v181_v52 = vmul.f32 %v141_v46, %v37_v42  ;;  %v174_v55 = vrot.slane %v160_v51, %v115_v14 }
  0x36   :  { %184 = vst [vmem:[#allocation7] sm:$0xff] %v180_v49  ;;  %v182_v56 = vmul.f32 %v158_v53, %v38_v50 }
  0x37   :  { %185 = vst [vmem:[#allocation7 + $0x8] sm:$0xff] %v181_v52  ;;  %v175_v58 = vcombine.low %v167_v54, %v174_v55 }
  0x38   :  { %186 = vst [vmem:[#allocation7 + $0x10] sm:$0xff] %v182_v56 }
  0x39   :  { %v183_v59 = vmul.f32 %v175_v58, %v39_v57 }
  0x3b   :  { %187 = vst [vmem:[#allocation7 + $0x18] sm:$0xff] %v183_v59 }
  0x3c   :  { %263 = shalt.err (!%p260_p6)
}
  0x3d   :  { %s264_s8 = scalar_lea.hbm %s337_s2, 512 }
  0x3e   :  { %p265_p7 = scmp.ne.s32.totalorder %s337_s2, %s264_s8  ;;  %p268_p8 = scmp.lt.u32.totalorder %s264_s8, %s337_s2 }
  0x40   :  { %p270_p9 = pnand %p268_p8, %p265_p7 }
  0x42   :  { %273 = shalt.err (!%p270_p9)
}
  0x43   :  { %197 = dma.vmem_to_hbm [thread:$0]  %s195_s4, 512, %s337_s2, [#allocation4]  }
  0x44   :  { %278 = dma.done.wait [#allocation4], 512  }
  0x45   :  { %279 = vsyncadd [#allocation4], 4294966784 }
  0x46   :  { %201 = vsyncpa [#allocation3], 1 }
  0x47   :  { %202 = vsyncpa [#allocation6], 1 }
  0x48   :  { %203 = vsyncpa [#allocation4], 1 }

</bundles_post_ra>
